<compile_context>
chip_gen: v5e
topology: v5e:2x2
jax: 0.10.0
libtpu: 0.0.40
codegen_flags: <defaults>
</compile_context>

<pallas_src>
import functools

import jax
import jax.numpy as jnp
from jax.experimental import pallas as pl
from jax.experimental.pallas import tpu as pltpu

F_IN, H1, H2, H3 = 16, 64, 32, 32
EPS = 1e-5
DROP_P = 0.1
NUM_PHASES = 3

# rows of the packed (16, 64) parameter blob
R_B1, R_G1, R_BE1, R_B2, R_B3, R_G2, R_BE2, R_WO, R_BO = range(9)


def _round_up(v, m):
    return ((v + m - 1) // m) * m


def mlp_kernel(seed_ref,                       # scalar prefetch (SMEM)
               x_ref, w1_ref, w2_ref, w3_ref, vec_ref,   # inputs
               o_ref,                          # output
               bn1_ref, bn2_ref,               # VMEM scratch (persist across grid steps)
               *, n_valid, tile_n, training):
    phase = pl.program_id(0)
    tile = pl.program_id(1)
    inv_n = 1.0 / float(n_valid)

    # Global row ids of this tile; rows >= n_valid are zero-padding and are masked out
    # of the BatchNorm statistics (their outputs are sliced off in the wrapper).
    row_ids = tile * tile_n + jax.lax.broadcasted_iota(jnp.int32, (tile_n, 1), 0)
    row_valid = row_ids < n_valid

    # Packed per-feature parameters.
    b1 = vec_ref[R_B1:R_B1 + 1, :]
    g1 = vec_ref[R_G1:R_G1 + 1, :]
    be1 = vec_ref[R_BE1:R_BE1 + 1, :]
    b2 = vec_ref[R_B2:R_B2 + 1, 0:H2]
    b3 = vec_ref[R_B3:R_B3 + 1, 0:H3]
    g2 = vec_ref[R_G2:R_G2 + 1, 0:H3]
    be2 = vec_ref[R_BE2:R_BE2 + 1, 0:H3]
    wo = vec_ref[R_WO:R_WO + 1, 0:H3]     # layer_out weight row (1/(1-p) pre-folded)
    bo = vec_ref[R_BO:R_BO + 1, 0:1]

    # layer_1 + ReLU (needed by every phase); all math in f32.
    x = x_ref[...].astype(jnp.float32)
    h1 = jnp.maximum(
        jnp.dot(x, w1_ref[...].astype(jnp.float32),
                preferred_element_type=jnp.float32) + b1, 0.0)

    def layers_2_3(h1n):
        h2 = jnp.maximum(
            jnp.dot(h1n, w2_ref[...].astype(jnp.float32),
                    preferred_element_type=jnp.float32) + b2, 0.0)
        h3 = jnp.maximum(
            jnp.dot(h2, w3_ref[...].astype(jnp.float32),
                    preferred_element_type=jnp.float32) + b3, 0.0)
        return h3

    # ---- phase 0: accumulate BN1 batch statistics --------------------------------
    @pl.when(phase == 0)
    def _phase0():
        @pl.when(tile == 0)
        def _():
            bn1_ref[...] = jnp.zeros_like(bn1_ref)

        hm = jnp.where(row_valid, h1, 0.0)
        bn1_ref[0:1, :] = bn1_ref[0:1, :] + jnp.sum(hm, axis=0, keepdims=True)
        bn1_ref[1:2, :] = bn1_ref[1:2, :] + jnp.sum(hm * hm, axis=0, keepdims=True)

    # ---- phase 1: finalize BN1, run layers 2-3, accumulate BN2 statistics --------
    @pl.when(phase == 1)
    def _phase1():
        @pl.when(tile == 0)
        def _():
            mean = bn1_ref[0:1, :] * inv_n
            var = jnp.maximum(bn1_ref[1:2, :] * inv_n - mean * mean, 0.0)
            scale = g1 * jax.lax.rsqrt(var + EPS)
            bn1_ref[2:3, :] = scale
            bn1_ref[3:4, :] = be1 - mean * scale
            bn2_ref[...] = jnp.zeros_like(bn2_ref)

        h1n = h1 * bn1_ref[2:3, :] + bn1_ref[3:4, :]
        h3 = layers_2_3(h1n)
        hm = jnp.where(row_valid, h3, 0.0)
        bn2_ref[0:1, :] = bn2_ref[0:1, :] + jnp.sum(hm, axis=0, keepdims=True)
        bn2_ref[1:2, :] = bn2_ref[1:2, :] + jnp.sum(hm * hm, axis=0, keepdims=True)

    # ---- phase 2: finalize BN2, full forward + dropout + layer_out ----------------
    @pl.when(phase == 2)
    def _phase2():
        @pl.when(tile == 0)
        def _():
            mean = bn2_ref[0:1, :] * inv_n
            var = jnp.maximum(bn2_ref[1:2, :] * inv_n - mean * mean, 0.0)
            scale = g2 * jax.lax.rsqrt(var + EPS)
            bn2_ref[2:3, :] = scale
            bn2_ref[3:4, :] = be2 - mean * scale

        h1n = h1 * bn1_ref[2:3, :] + bn1_ref[3:4, :]
        h3 = layers_2_3(h1n)
        h3 = h3 * bn2_ref[2:3, :] + bn2_ref[3:4, :]

        if training:
            # Counter-based hash PRNG (portable; works on TPU and interpret mode).
            # keep-prob = 1 - DROP_P; the 1/(1-p) scale is folded into `wo`.
            seed = seed_ref[0].astype(jnp.uint32)
            cols = jax.lax.broadcasted_iota(jnp.int32, (tile_n, H3), 1)
            z = (row_ids * H3 + cols).astype(jnp.uint32) + seed * jnp.uint32(2654435761)
            z = z ^ (z >> 16)
            z = z * jnp.uint32(0x7FEB352D)
            z = z ^ (z >> 15)
            z = z * jnp.uint32(0x846CA68B)
            z = z ^ (z >> 16)
            keep = z >= jnp.uint32(int(DROP_P * 4294967296.0))
            h3 = jnp.where(keep, h3, 0.0)

        # layer_out as broadcast-mul + lane reduction (avoids a 1-lane MXU matmul).
        out = jnp.sum(h3 * wo, axis=1, keepdims=True) + bo
        o_ref[...] = out.astype(o_ref.dtype)


def binary_classification_forward(x, params, *, training=True, seed=0, tile_n=None):
    n, f_in = x.shape
    assert f_in == F_IN

    if tile_n is None:
        tile_n = min(1024, _round_up(n, 8))   # sized for v7x's 64 MiB VMEM as well
    tile_n = _round_up(tile_n, 8)
    n_pad = _round_up(n, tile_n)
    num_tiles = n_pad // tile_n
    x_pad = jnp.pad(x, ((0, n_pad - n), (0, 0))) if n_pad != n else x

    def row64(v):
        v = jnp.ravel(v).astype(jnp.float32)
        return jnp.pad(v, (0, H1 - v.shape[0]))

    keep_scale = (1.0 / (1.0 - DROP_P)) if training else 1.0
    wo_row = jnp.ravel(params["wo"]).astype(jnp.float32) * keep_scale
    vec = jnp.stack(
        [row64(params["b1"]), row64(params["g1"]), row64(params["be1"]),
         row64(params["b2"]), row64(params["b3"]),
         row64(params["g2"]), row64(params["be2"]),
         row64(wo_row), row64(params["bo"])]
        + [jnp.zeros((H1,), jnp.float32)] * 7)                 # (16, 64)

    seed_arr = jnp.asarray([seed], dtype=jnp.int32)

    kernel = functools.partial(mlp_kernel, n_valid=n, tile_n=tile_n, training=training)

    grid_spec = pltpu.PrefetchScalarGridSpec(
        num_scalar_prefetch=1,
        grid=(NUM_PHASES, num_tiles),
        in_specs=[
            pl.BlockSpec((tile_n, F_IN), lambda p, t, s: (t, 0)),   # x tile (pipelined)
            pl.BlockSpec((F_IN, H1), lambda p, t, s: (0, 0)),       # W1 (resident)
            pl.BlockSpec((H1, H2), lambda p, t, s: (0, 0)),         # W2 (resident)
            pl.BlockSpec((H2, H3), lambda p, t, s: (0, 0)),         # W3 (resident)
            pl.BlockSpec((16, H1), lambda p, t, s: (0, 0)),         # packed vec blob
        ],
        out_specs=pl.BlockSpec((tile_n, 1), lambda p, t, s: (t, 0)),
        scratch_shapes=[pltpu.VMEM((8, H1), jnp.float32),           # BN1 sum/sumsq/scale/shift
                        pltpu.VMEM((8, H2), jnp.float32)],          # BN2 sum/sumsq/scale/shift
    )

    x_bytes = int(x_pad.size) * x_pad.dtype.itemsize
    param_bytes = 4 * (F_IN * H1 + H1 * H2 + H2 * H3 + 16 * H1)
    cost = pl.CostEstimate(
        flops=int(NUM_PHASES * n_pad * 2 * (F_IN * H1 + H1 * H2 + H2 * H3 + H3)),
        transcendentals=0,
        bytes_accessed=int(NUM_PHASES * x_bytes + n_pad * 4 + param_bytes),
    )

    out = pl.pallas_call(
        kernel,
        out_shape=jax.ShapeDtypeStruct((n_pad, 1), jnp.float32),
        grid_spec=grid_spec,
        compiler_params=pltpu.CompilerParams(
            dimension_semantics=("arbitrary", "arbitrary"),  # phases & stat-accumulation are sequential
            vmem_limit_bytes=32 * 1024 * 1024),
        cost_estimate=cost,
    )(seed_arr, x_pad, params["w1"], params["w2"], params["w3"], vec)
    return out[:n]


def _reference_no_dropout(x, p):
    """Pure-JAX reference (training-mode BN, dropout disabled)."""
    h = jnp.maximum(x @ p["w1"] + p["b1"], 0.0)
    mu = h.mean(0, keepdims=True)
    var = jnp.mean(jnp.square(h - mu), 0, keepdims=True)
    h = (h - mu) / jnp.sqrt(var + EPS) * p["g1"] + p["be1"]
    h = jnp.maximum(h @ p["w2"] + p["b2"], 0.0)
    h = jnp.maximum(h @ p["w3"] + p["b3"], 0.0)
    mu = h.mean(0, keepdims=True)
    var = jnp.mean(jnp.square(h - mu), 0, keepdims=True)
    h = (h - mu) / jnp.sqrt(var + EPS) * p["g2"] + p["be2"]
    return h @ p["wo"] + p["bo"]


if __name__ == "__main__":
    key = jax.random.PRNGKey(0)
    keys = jax.random.split(key, 7)

    def linear_init(k, fan_in, fan_out):
        # PyTorch nn.Linear default: U(-1/sqrt(fan_in), 1/sqrt(fan_in)).
        kw, kb = jax.random.split(k)
        bound = 1.0 / (fan_in ** 0.5)
        w = jax.random.uniform(kw, (fan_in, fan_out), jnp.float32, -bound, bound)
        b = jax.random.uniform(kb, (fan_out,), jnp.float32, -bound, bound)
        return w, b

    w1, b1 = linear_init(keys[0], F_IN, H1)
    w2, b2 = linear_init(keys[1], H1, H2)
    w3, b3 = linear_init(keys[2], H2, H3)
    wo, bo = linear_init(keys[3], H3, 1)

    params = dict(
        w1=w1, b1=b1, g1=jnp.ones((H1,), jnp.float32), be1=jnp.zeros((H1,), jnp.float32),
        w2=w2, b2=b2,
        w3=w3, b3=b3, g2=jnp.ones((H2,), jnp.float32), be2=jnp.zeros((H2,), jnp.float32),
        wo=wo, bo=bo,
    )

    # Small batch, single tile.
    batch = 8
    x = jax.random.normal(keys[4], (batch, F_IN), jnp.float32)
    out_eval = jax.block_until_ready(
        binary_classification_forward(x, params, training=False))
    ref = _reference_no_dropout(x, params)
    assert out_eval.shape == (batch, 1)
    assert jnp.allclose(out_eval, ref, atol=1e-3, rtol=1e-3)

    # Larger batch, multiple tiles + ragged padding (exercises the 3-phase batch-wide BN).
    n_big = 200
    xb = jax.random.normal(keys[5], (n_big, F_IN), jnp.float32)
    out_big = jax.block_until_ready(
        binary_classification_forward(xb, params, training=False, tile_n=64))
    ref_big = _reference_no_dropout(xb, params)
    assert out_big.shape == (n_big, 1)
    assert jnp.allclose(out_big, ref_big, atol=1e-3, rtol=1e-3)

    # Training-mode forward: batch-stat BN + hashed dropout (runtime seed, no recompile).
    out_train = jax.block_until_ready(
        binary_classification_forward(xb, params, training=True, seed=1234, tile_n=64))
    assert out_train.shape == (n_big, 1)
    assert bool(jnp.all(jnp.isfinite(out_train)))

    # bf16 input stream (halves x HBM bytes on v6e/v7x); compute stays f32 in-kernel.
    out_bf16 = jax.block_until_ready(
        binary_classification_forward(xb.astype(jnp.bfloat16), params,
                                      training=True, seed=7, tile_n=64))
    assert out_bf16.shape == (n_big, 1)

    print("KERNEL_OK")
</pallas_src>

<mosaic_0001>
module attributes {stable_mosaic.version = 11 : i64} {
  func.func @mlp_kernel(%arg0: i32, %arg1: i32, %arg2: memref<1xi32, #tpu.memory_space<smem>>, %arg3: memref<8x16xf32, #tpu.memory_space<vmem>>, %arg4: memref<16x64xf32, #tpu.memory_space<vmem>>, %arg5: memref<64x32xf32, #tpu.memory_space<vmem>>, %arg6: memref<32x32xf32, #tpu.memory_space<vmem>>, %arg7: memref<16x64xf32, #tpu.memory_space<vmem>>, %arg8: memref<8x1xf32, #tpu.memory_space<vmem>>, %arg9: memref<8x64xf32, #tpu.memory_space<vmem>>, %arg10: memref<8x32xf32, #tpu.memory_space<vmem>>) attributes {dimension_semantics = [#tpu.dimension_semantics<arbitrary>, #tpu.dimension_semantics<arbitrary>], iteration_bounds = array<i64: 3, 1>, scalar_prefetch = 1 : i64, scratch_operands = 2 : i64, tpu.core_type = #tpu.core_type<tc>, window_params = [{transform_indices = @transform_0, window_bounds = array<i64: 8, 16>}, {pipeline_mode = #tpu.pipeline_mode<synchronous>, transform_indices = @transform_1, window_bounds = array<i64: 16, 64>}, {pipeline_mode = #tpu.pipeline_mode<synchronous>, transform_indices = @transform_2, window_bounds = array<i64: 64, 32>}, {pipeline_mode = #tpu.pipeline_mode<synchronous>, transform_indices = @transform_3, window_bounds = array<i64: 32, 32>}, {pipeline_mode = #tpu.pipeline_mode<synchronous>, transform_indices = @transform_4, window_bounds = array<i64: 16, 64>}, {transform_indices = @transform_5, window_bounds = array<i64: 8, 1>}]} {
    %c8_i32 = arith.constant 8 : i32
    %0 = arith.muli %arg1, %c8_i32 : i32
    %1 = tpu.iota {dimensions = array<i32: 0>} : vector<8x1xi32>
    %2 = vector.broadcast %0 : i32 to vector<8x1xi32>
    %3 = arith.addi %2, %1 : vector<8x1xi32>
    %c8_i32_0 = arith.constant 8 : i32
    %4 = vector.broadcast %c8_i32_0 : i32 to vector<8x1xi32>
    %5 = arith.cmpi slt, %3, %4 : vector<8x1xi32>
    %c0 = arith.constant 0 : index
    %c0_1 = arith.constant 0 : index
    %6 = vector.load %arg7[%c0, %c0_1] : memref<16x64xf32, #tpu.memory_space<vmem>>, vector<1x64xf32>
    %c1 = arith.constant 1 : index
    %c0_2 = arith.constant 0 : index
    %7 = vector.load %arg7[%c1, %c0_2] : memref<16x64xf32, #tpu.memory_space<vmem>>, vector<1x64xf32>
    %c2 = arith.constant 2 : index
    %c0_3 = arith.constant 0 : index
    %8 = vector.load %arg7[%c2, %c0_3] : memref<16x64xf32, #tpu.memory_space<vmem>>, vector<1x64xf32>
    %c3 = arith.constant 3 : index
    %c0_4 = arith.constant 0 : index
    %9 = vector.load %arg7[%c3, %c0_4] : memref<16x64xf32, #tpu.memory_space<vmem>>, vector<1x32xf32>
    %c4 = arith.constant 4 : index
    %c0_5 = arith.constant 0 : index
    %10 = vector.load %arg7[%c4, %c0_5] : memref<16x64xf32, #tpu.memory_space<vmem>>, vector<1x32xf32>
    %c5 = arith.constant 5 : index
    %c0_6 = arith.constant 0 : index
    %11 = vector.load %arg7[%c5, %c0_6] : memref<16x64xf32, #tpu.memory_space<vmem>>, vector<1x32xf32>
    %c6 = arith.constant 6 : index
    %c0_7 = arith.constant 0 : index
    %12 = vector.load %arg7[%c6, %c0_7] : memref<16x64xf32, #tpu.memory_space<vmem>>, vector<1x32xf32>
    %c7 = arith.constant 7 : index
    %c0_8 = arith.constant 0 : index
    %13 = vector.load %arg7[%c7, %c0_8] : memref<16x64xf32, #tpu.memory_space<vmem>>, vector<1x32xf32>
    %c8 = arith.constant 8 : index
    %c0_9 = arith.constant 0 : index
    %14 = vector.load %arg7[%c8, %c0_9] : memref<16x64xf32, #tpu.memory_space<vmem>>, vector<1x1xf32>
    %c0_10 = arith.constant 0 : index
    %c0_11 = arith.constant 0 : index
    %15 = vector.load %arg3[%c0_10, %c0_11] : memref<8x16xf32, #tpu.memory_space<vmem>>, vector<8x16xf32>
    %c0_12 = arith.constant 0 : index
    %c0_13 = arith.constant 0 : index
    %16 = vector.load %arg4[%c0_12, %c0_13] : memref<16x64xf32, #tpu.memory_space<vmem>>, vector<16x64xf32>
    %cst = arith.constant dense<0.000000e+00> : vector<8x64xf32>
    %17 = tpu.matmul %15, %16, %cst {dimension_numbers = #tpu.dot_dimension_numbers<[1], [0], [0], [1], [0, 0, 1, 1], [], []>} : vector<8x16xf32>, vector<16x64xf32>, vector<8x64xf32> -> vector<8x64xf32>
    %18 = vector.broadcast %6 : vector<1x64xf32> to vector<8x64xf32>
    %19 = arith.addf %17, %18 : vector<8x64xf32>
    %cst_14 = arith.constant 0.000000e+00 : f32
    %20 = vector.broadcast %cst_14 : f32 to vector<8x64xf32>
    %21 = arith.maximumf %19, %20 : vector<8x64xf32>
    %c0_i32 = arith.constant 0 : i32
    %22 = arith.cmpi eq, %arg0, %c0_i32 : i32
    %23 = arith.extui %22 : i1 to i32
    %c0_i32_15 = arith.constant 0 : i32
    %24 = arith.cmpi ne, %23, %c0_i32_15 : i32
    scf.if %24 {
      %c0_i32_18 = arith.constant 0 : i32
      %31 = arith.cmpi eq, %arg1, %c0_i32_18 : i32
      %32 = arith.extui %31 : i1 to i32
      %c0_i32_19 = arith.constant 0 : i32
      %33 = arith.cmpi ne, %32, %c0_i32_19 : i32
      scf.if %33 {
        %cst_31 = arith.constant 0.000000e+00 : f32
        %49 = vector.broadcast %cst_31 : f32 to vector<8x64xf32>
        %c0_32 = arith.constant 0 : index
        %c0_33 = arith.constant 0 : index
        %50 = vector.load %arg9[%c0_32, %c0_33] : memref<8x64xf32, #tpu.memory_space<vmem>>, vector<8x64xf32>
        tpu.vector_store %arg9[%c0_32, %c0_33], %49 {strides = array<i32>} : memref<8x64xf32, #tpu.memory_space<vmem>>, vector<8x64xf32>,
      } else {
      }
      %cst_20 = arith.constant 0.000000e+00 : f32
      %34 = vector.shape_cast %5 : vector<8x1xi1> to vector<8x1xi1>
      %35 = vector.broadcast %34 : vector<8x1xi1> to vector<8x64xi1>
      %36 = vector.broadcast %cst_20 : f32 to vector<8x64xf32>
      %37 = arith.select %35, %21, %36 : vector<8x64xi1>, vector<8x64xf32>
      %c0_21 = arith.constant 0 : index
      %c0_22 = arith.constant 0 : index
      %38 = vector.load %arg9[%c0_21, %c0_22] : memref<8x64xf32, #tpu.memory_space<vmem>>, vector<1x64xf32>
      %cst_23 = arith.constant dense<0.000000e+00> : vector<64xf32>
      %39 = vector.multi_reduction <add>, %37, %cst_23 [0] : vector<8x64xf32> to vector<64xf32>
      %40 = vector.shape_cast %39 : vector<64xf32> to vector<1x64xf32>
      %41 = arith.addf %38, %40 : vector<1x64xf32>
      %c0_24 = arith.constant 0 : index
      %c0_25 = arith.constant 0 : index
      %42 = vector.load %arg9[%c0_24, %c0_25] : memref<8x64xf32, #tpu.memory_space<vmem>>, vector<1x64xf32>
      tpu.vector_store %arg9[%c0_24, %c0_25], %41 {strides = array<i32>} : memref<8x64xf32, #tpu.memory_space<vmem>>, vector<1x64xf32>,
      %c1_26 = arith.constant 1 : index
      %c0_27 = arith.constant 0 : index
      %43 = vector.load %arg9[%c1_26, %c0_27] : memref<8x64xf32, #tpu.memory_space<vmem>>, vector<1x64xf32>
      %44 = arith.mulf %37, %37 : vector<8x64xf32>
      %cst_28 = arith.constant dense<0.000000e+00> : vector<64xf32>
      %45 = vector.multi_reduction <add>, %44, %cst_28 [0] : vector<8x64xf32> to vector<64xf32>
      %46 = vector.shape_cast %45 : vector<64xf32> to vector<1x64xf32>
      %47 = arith.addf %43, %46 : vector<1x64xf32>
      %c1_29 = arith.constant 1 : index
      %c0_30 = arith.constant 0 : index
      %48 = vector.load %arg9[%c1_29, %c0_30] : memref<8x64xf32, #tpu.memory_space<vmem>>, vector<1x64xf32>
      tpu.vector_store %arg9[%c1_29, %c0_30], %47 {strides = array<i32>} : memref<8x64xf32, #tpu.memory_space<vmem>>, vector<1x64xf32>,
    } else {
    }
    %c1_i32 = arith.constant 1 : i32
    %25 = arith.cmpi eq, %arg0, %c1_i32 : i32
    %26 = arith.extui %25 : i1 to i32
    %c0_i32_16 = arith.constant 0 : i32
    %27 = arith.cmpi ne, %26, %c0_i32_16 : i32
    scf.if %27 {
      %c0_i32_18 = arith.constant 0 : i32
      %31 = arith.cmpi eq, %arg1, %c0_i32_18 : i32
      %32 = arith.extui %31 : i1 to i32
      %c0_i32_19 = arith.constant 0 : i32
      %33 = arith.cmpi ne, %32, %c0_i32_19 : i32
      scf.if %33 {
        %c0_43 = arith.constant 0 : index
        %c0_44 = arith.constant 0 : index
        %67 = vector.load %arg9[%c0_43, %c0_44] : memref<8x64xf32, #tpu.memory_space<vmem>>, vector<1x64xf32>
        %cst_45 = arith.constant 1.250000e-01 : f32
        %68 = vector.broadcast %cst_45 : f32 to vector<1x64xf32>
        %69 = arith.mulf %67, %68 : vector<1x64xf32>
        %c1_46 = arith.constant 1 : index
        %c0_47 = arith.constant 0 : index
        %70 = vector.load %arg9[%c1_46, %c0_47] : memref<8x64xf32, #tpu.memory_space<vmem>>, vector<1x64xf32>
        %cst_48 = arith.constant 1.250000e-01 : f32
        %71 = vector.broadcast %cst_48 : f32 to vector<1x64xf32>
        %72 = arith.mulf %70, %71 : vector<1x64xf32>
        %73 = arith.mulf %69, %69 : vector<1x64xf32>
        %74 = arith.subf %72, %73 : vector<1x64xf32>
        %cst_49 = arith.constant 0.000000e+00 : f32
        %75 = vector.broadcast %cst_49 : f32 to vector<1x64xf32>
        %76 = arith.maximumf %74, %75 : vector<1x64xf32>
        %cst_50 = arith.constant 9.99999974E-6 : f32
        %77 = vector.broadcast %cst_50 : f32 to vector<1x64xf32>
        %78 = arith.addf %76, %77 : vector<1x64xf32>
        %79 = math.rsqrt %78 : vector<1x64xf32>
        %80 = arith.mulf %7, %79 : vector<1x64xf32>
        %c2_51 = arith.constant 2 : index
        %c0_52 = arith.constant 0 : index
        %81 = vector.load %arg9[%c2_51, %c0_52] : memref<8x64xf32, #tpu.memory_space<vmem>>, vector<1x64xf32>
        tpu.vector_store %arg9[%c2_51, %c0_52], %80 {strides = array<i32>} : memref<8x64xf32, #tpu.memory_space<vmem>>, vector<1x64xf32>,
        %82 = arith.mulf %69, %80 : vector<1x64xf32>
        %83 = arith.subf %8, %82 : vector<1x64xf32>
        %c3_53 = arith.constant 3 : index
        %c0_54 = arith.constant 0 : index
        %84 = vector.load %arg9[%c3_53, %c0_54] : memref<8x64xf32, #tpu.memory_space<vmem>>, vector<1x64xf32>
        tpu.vector_store %arg9[%c3_53, %c0_54], %83 {strides = array<i32>} : memref<8x64xf32, #tpu.memory_space<vmem>>, vector<1x64xf32>,
        %cst_55 = arith.constant 0.000000e+00 : f32
        %85 = vector.broadcast %cst_55 : f32 to vector<8x32xf32>
        %c0_56 = arith.constant 0 : index
        %c0_57 = arith.constant 0 : index
        %86 = vector.load %arg10[%c0_56, %c0_57] : memref<8x32xf32, #tpu.memory_space<vmem>>, vector<8x32xf32>
        tpu.vector_store %arg10[%c0_56, %c0_57], %85 {strides = array<i32>} : memref<8x32xf32, #tpu.memory_space<vmem>>, vector<8x32xf32>,
      } else {
      }
      %c2_20 = arith.constant 2 : index
      %c0_21 = arith.constant 0 : index
      %34 = vector.load %arg9[%c2_20, %c0_21] : memref<8x64xf32, #tpu.memory_space<vmem>>, vector<1x64xf32>
      %35 = vector.broadcast %34 : vector<1x64xf32> to vector<8x64xf32>
      %36 = arith.mulf %21, %35 : vector<8x64xf32>
      %c3_22 = arith.constant 3 : index
      %c0_23 = arith.constant 0 : index
      %37 = vector.load %arg9[%c3_22, %c0_23] : memref<8x64xf32, #tpu.memory_space<vmem>>, vector<1x64xf32>
      %38 = vector.broadcast %37 : vector<1x64xf32> to vector<8x64xf32>
      %39 = arith.addf %36, %38 : vector<8x64xf32>
      %c0_24 = arith.constant 0 : index
      %c0_25 = arith.constant 0 : index
      %40 = vector.load %arg5[%c0_24, %c0_25] : memref<64x32xf32, #tpu.memory_space<vmem>>, vector<64x32xf32>
      %cst_26 = arith.constant dense<0.000000e+00> : vector<8x32xf32>
      %41 = tpu.matmul %39, %40, %cst_26 {dimension_numbers = #tpu.dot_dimension_numbers<[1], [0], [0], [1], [0, 0, 1, 1], [], []>} : vector<8x64xf32>, vector<64x32xf32>, vector<8x32xf32> -> vector<8x32xf32>
      %42 = vector.broadcast %9 : vector<1x32xf32> to vector<8x32xf32>
      %43 = arith.addf %41, %42 : vector<8x32xf32>
      %cst_27 = arith.constant 0.000000e+00 : f32
      %44 = vector.broadcast %cst_27 : f32 to vector<8x32xf32>
      %45 = arith.maximumf %43, %44 : vector<8x32xf32>
      %c0_28 = arith.constant 0 : index
      %c0_29 = arith.constant 0 : index
      %46 = vector.load %arg6[%c0_28, %c0_29] : memref<32x32xf32, #tpu.memory_space<vmem>>, vector<32x32xf32>
      %cst_30 = arith.constant dense<0.000000e+00> : vector<8x32xf32>
      %47 = tpu.matmul %45, %46, %cst_30 {dimension_numbers = #tpu.dot_dimension_numbers<[1], [0], [0], [1], [0, 0, 1, 1], [], []>} : vector<8x32xf32>, vector<32x32xf32>, vector<8x32xf32> -> vector<8x32xf32>
      %48 = vector.broadcast %10 : vector<1x32xf32> to vector<8x32xf32>
      %49 = arith.addf %47, %48 : vector<8x32xf32>
      %cst_31 = arith.constant 0.000000e+00 : f32
      %50 = vector.broadcast %cst_31 : f32 to vector<8x32xf32>
      %51 = arith.maximumf %49, %50 : vector<8x32xf32>
      %cst_32 = arith.constant 0.000000e+00 : f32
      %52 = vector.shape_cast %5 : vector<8x1xi1> to vector<8x1xi1>
      %53 = vector.broadcast %52 : vector<8x1xi1> to vector<8x32xi1>
      %54 = vector.broadcast %cst_32 : f32 to vector<8x32xf32>
      %55 = arith.select %53, %51, %54 : vector<8x32xi1>, vector<8x32xf32>
      %c0_33 = arith.constant 0 : index
      %c0_34 = arith.constant 0 : index
      %56 = vector.load %arg10[%c0_33, %c0_34] : memref<8x32xf32, #tpu.memory_space<vmem>>, vector<1x32xf32>
      %cst_35 = arith.constant dense<0.000000e+00> : vector<32xf32>
      %57 = vector.multi_reduction <add>, %55, %cst_35 [0] : vector<8x32xf32> to vector<32xf32>
      %58 = vector.shape_cast %57 : vector<32xf32> to vector<1x32xf32>
      %59 = arith.addf %56, %58 : vector<1x32xf32>
      %c0_36 = arith.constant 0 : index
      %c0_37 = arith.constant 0 : index
      %60 = vector.load %arg10[%c0_36, %c0_37] : memref<8x32xf32, #tpu.memory_space<vmem>>, vector<1x32xf32>
      tpu.vector_store %arg10[%c0_36, %c0_37], %59 {strides = array<i32>} : memref<8x32xf32, #tpu.memory_space<vmem>>, vector<1x32xf32>,
      %c1_38 = arith.constant 1 : index
      %c0_39 = arith.constant 0 : index
      %61 = vector.load %arg10[%c1_38, %c0_39] : memref<8x32xf32, #tpu.memory_space<vmem>>, vector<1x32xf32>
      %62 = arith.mulf %55, %55 : vector<8x32xf32>
      %cst_40 = arith.constant dense<0.000000e+00> : vector<32xf32>
      %63 = vector.multi_reduction <add>, %62, %cst_40 [0] : vector<8x32xf32> to vector<32xf32>
      %64 = vector.shape_cast %63 : vector<32xf32> to vector<1x32xf32>
      %65 = arith.addf %61, %64 : vector<1x32xf32>
      %c1_41 = arith.constant 1 : index
      %c0_42 = arith.constant 0 : index
      %66 = vector.load %arg10[%c1_41, %c0_42] : memref<8x32xf32, #tpu.memory_space<vmem>>, vector<1x32xf32>
      tpu.vector_store %arg10[%c1_41, %c0_42], %65 {strides = array<i32>} : memref<8x32xf32, #tpu.memory_space<vmem>>, vector<1x32xf32>,
    } else {
    }
    %c2_i32 = arith.constant 2 : i32
    %28 = arith.cmpi eq, %arg0, %c2_i32 : i32
    %29 = arith.extui %28 : i1 to i32
    %c0_i32_17 = arith.constant 0 : i32
    %30 = arith.cmpi ne, %29, %c0_i32_17 : i32
    scf.if %30 {
      %c0_i32_18 = arith.constant 0 : i32
      %31 = arith.cmpi eq, %arg1, %c0_i32_18 : i32
      %32 = arith.extui %31 : i1 to i32
      %c0_i32_19 = arith.constant 0 : i32
      %33 = arith.cmpi ne, %32, %c0_i32_19 : i32
      scf.if %33 {
        %c0_39 = arith.constant 0 : index
        %c0_40 = arith.constant 0 : index
        %65 = vector.load %arg10[%c0_39, %c0_40] : memref<8x32xf32, #tpu.memory_space<vmem>>, vector<1x32xf32>
        %cst_41 = arith.constant 1.250000e-01 : f32
        %66 = vector.broadcast %cst_41 : f32 to vector<1x32xf32>
        %67 = arith.mulf %65, %66 : vector<1x32xf32>
        %c1_42 = arith.constant 1 : index
        %c0_43 = arith.constant 0 : index
        %68 = vector.load %arg10[%c1_42, %c0_43] : memref<8x32xf32, #tpu.memory_space<vmem>>, vector<1x32xf32>
        %cst_44 = arith.constant 1.250000e-01 : f32
        %69 = vector.broadcast %cst_44 : f32 to vector<1x32xf32>
        %70 = arith.mulf %68, %69 : vector<1x32xf32>
        %71 = arith.mulf %67, %67 : vector<1x32xf32>
        %72 = arith.subf %70, %71 : vector<1x32xf32>
        %cst_45 = arith.constant 0.000000e+00 : f32
        %73 = vector.broadcast %cst_45 : f32 to vector<1x32xf32>
        %74 = arith.maximumf %72, %73 : vector<1x32xf32>
        %cst_46 = arith.constant 9.99999974E-6 : f32
        %75 = vector.broadcast %cst_46 : f32 to vector<1x32xf32>
        %76 = arith.addf %74, %75 : vector<1x32xf32>
        %77 = math.rsqrt %76 : vector<1x32xf32>
        %78 = arith.mulf %11, %77 : vector<1x32xf32>
        %c2_47 = arith.constant 2 : index
        %c0_48 = arith.constant 0 : index
        %79 = vector.load %arg10[%c2_47, %c0_48] : memref<8x32xf32, #tpu.memory_space<vmem>>, vector<1x32xf32>
        tpu.vector_store %arg10[%c2_47, %c0_48], %78 {strides = array<i32>} : memref<8x32xf32, #tpu.memory_space<vmem>>, vector<1x32xf32>,
        %80 = arith.mulf %67, %78 : vector<1x32xf32>
        %81 = arith.subf %12, %80 : vector<1x32xf32>
        %c3_49 = arith.constant 3 : index
        %c0_50 = arith.constant 0 : index
        %82 = vector.load %arg10[%c3_49, %c0_50] : memref<8x32xf32, #tpu.memory_space<vmem>>, vector<1x32xf32>
        tpu.vector_store %arg10[%c3_49, %c0_50], %81 {strides = array<i32>} : memref<8x32xf32, #tpu.memory_space<vmem>>, vector<1x32xf32>,
      } else {
      }
      %c2_20 = arith.constant 2 : index
      %c0_21 = arith.constant 0 : index
      %34 = vector.load %arg9[%c2_20, %c0_21] : memref<8x64xf32, #tpu.memory_space<vmem>>, vector<1x64xf32>
      %35 = vector.broadcast %34 : vector<1x64xf32> to vector<8x64xf32>
      %36 = arith.mulf %21, %35 : vector<8x64xf32>
      %c3_22 = arith.constant 3 : index
      %c0_23 = arith.constant 0 : index
      %37 = vector.load %arg9[%c3_22, %c0_23] : memref<8x64xf32, #tpu.memory_space<vmem>>, vector<1x64xf32>
      %38 = vector.broadcast %37 : vector<1x64xf32> to vector<8x64xf32>
      %39 = arith.addf %36, %38 : vector<8x64xf32>
      %c0_24 = arith.constant 0 : index
      %c0_25 = arith.constant 0 : index
      %40 = vector.load %arg5[%c0_24, %c0_25] : memref<64x32xf32, #tpu.memory_space<vmem>>, vector<64x32xf32>
      %cst_26 = arith.constant dense<0.000000e+00> : vector<8x32xf32>
      %41 = tpu.matmul %39, %40, %cst_26 {dimension_numbers = #tpu.dot_dimension_numbers<[1], [0], [0], [1], [0, 0, 1, 1], [], []>} : vector<8x64xf32>, vector<64x32xf32>, vector<8x32xf32> -> vector<8x32xf32>
      %42 = vector.broadcast %9 : vector<1x32xf32> to vector<8x32xf32>
      %43 = arith.addf %41, %42 : vector<8x32xf32>
      %cst_27 = arith.constant 0.000000e+00 : f32
      %44 = vector.broadcast %cst_27 : f32 to vector<8x32xf32>
      %45 = arith.maximumf %43, %44 : vector<8x32xf32>
      %c0_28 = arith.constant 0 : index
      %c0_29 = arith.constant 0 : index
      %46 = vector.load %arg6[%c0_28, %c0_29] : memref<32x32xf32, #tpu.memory_space<vmem>>, vector<32x32xf32>
      %cst_30 = arith.constant dense<0.000000e+00> : vector<8x32xf32>
      %47 = tpu.matmul %45, %46, %cst_30 {dimension_numbers = #tpu.dot_dimension_numbers<[1], [0], [0], [1], [0, 0, 1, 1], [], []>} : vector<8x32xf32>, vector<32x32xf32>, vector<8x32xf32> -> vector<8x32xf32>
      %48 = vector.broadcast %10 : vector<1x32xf32> to vector<8x32xf32>
      %49 = arith.addf %47, %48 : vector<8x32xf32>
      %cst_31 = arith.constant 0.000000e+00 : f32
      %50 = vector.broadcast %cst_31 : f32 to vector<8x32xf32>
      %51 = arith.maximumf %49, %50 : vector<8x32xf32>
      %c2_32 = arith.constant 2 : index
      %c0_33 = arith.constant 0 : index
      %52 = vector.load %arg10[%c2_32, %c0_33] : memref<8x32xf32, #tpu.memory_space<vmem>>, vector<1x32xf32>
      %53 = vector.broadcast %52 : vector<1x32xf32> to vector<8x32xf32>
      %54 = arith.mulf %51, %53 : vector<8x32xf32>
      %c3_34 = arith.constant 3 : index
      %c0_35 = arith.constant 0 : index
      %55 = vector.load %arg10[%c3_34, %c0_35] : memref<8x32xf32, #tpu.memory_space<vmem>>, vector<1x32xf32>
      %56 = vector.broadcast %55 : vector<1x32xf32> to vector<8x32xf32>
      %57 = arith.addf %54, %56 : vector<8x32xf32>
      %58 = vector.broadcast %13 : vector<1x32xf32> to vector<8x32xf32>
      %59 = arith.mulf %57, %58 : vector<8x32xf32>
      %cst_36 = arith.constant dense<0.000000e+00> : vector<8xf32>
      %60 = vector.multi_reduction <add>, %59, %cst_36 [1] : vector<8x32xf32> to vector<8xf32>
      %61 = vector.shape_cast %60 : vector<8xf32> to vector<8x1xf32>
      %62 = vector.broadcast %14 : vector<1x1xf32> to vector<8x1xf32>
      %63 = arith.addf %61, %62 : vector<8x1xf32>
      %c0_37 = arith.constant 0 : index
      %c0_38 = arith.constant 0 : index
      %64 = vector.load %arg8[%c0_37, %c0_38] : memref<8x1xf32, #tpu.memory_space<vmem>>, vector<8x1xf32>
      tpu.vector_store %arg8[%c0_37, %c0_38], %63 {strides = array<i32>} : memref<8x1xf32, #tpu.memory_space<vmem>>, vector<8x1xf32>,
    } else {
    }
    return
  }
  func.func @transform_0(%arg0: i32, %arg1: i32, %arg2: memref<1xi32, #tpu.memory_space<smem>>) -> (i32, i32) {
    %c0_i32 = arith.constant 0 : i32
    %c0_i32_0 = arith.constant 0 : i32
    return %arg1, %c0_i32 : i32, i32
  }
  func.func @transform_1(%arg0: i32, %arg1: i32, %arg2: memref<1xi32, #tpu.memory_space<smem>>) -> (i32, i32) {
    %c0_i32 = arith.constant 0 : i32
    %c0_i32_0 = arith.constant 0 : i32
    %c0_i32_1 = arith.constant 0 : i32
    return %c0_i32, %c0_i32_0 : i32, i32
  }
  func.func @transform_2(%arg0: i32, %arg1: i32, %arg2: memref<1xi32, #tpu.memory_space<smem>>) -> (i32, i32) {
    %c0_i32 = arith.constant 0 : i32
    %c0_i32_0 = arith.constant 0 : i32
    %c0_i32_1 = arith.constant 0 : i32
    return %c0_i32, %c0_i32_0 : i32, i32
  }
  func.func @transform_3(%arg0: i32, %arg1: i32, %arg2: memref<1xi32, #tpu.memory_space<smem>>) -> (i32, i32) {
    %c0_i32 = arith.constant 0 : i32
    %c0_i32_0 = arith.constant 0 : i32
    %c0_i32_1 = arith.constant 0 : i32
    return %c0_i32, %c0_i32_0 : i32, i32
  }
  func.func @transform_4(%arg0: i32, %arg1: i32, %arg2: memref<1xi32, #tpu.memory_space<smem>>) -> (i32, i32) {
    %c0_i32 = arith.constant 0 : i32
    %c0_i32_0 = arith.constant 0 : i32
    %c0_i32_1 = arith.constant 0 : i32
    return %c0_i32, %c0_i32_0 : i32, i32
  }
  func.func @transform_5(%arg0: i32, %arg1: i32, %arg2: memref<1xi32, #tpu.memory_space<smem>>) -> (i32, i32) {
    %c0_i32 = arith.constant 0 : i32
    %c0_i32_0 = arith.constant 0 : i32
    return %arg1, %c0_i32 : i32, i32
  }
}

</mosaic_0001>

<bundles_post_ra>
// kernel: tpu_custom_call.1
= control target key start
LH: loop header
LB: loop body
LE: loop exit
PB: predicated region body
PF: predicated region fallthrough
CT: control target
= control target key end

     0   :  { %s735_s21 = smov 0   ;;  %s737_s0 = smov 0   ;;  %s917_s0 = inlined_call_operand.<no memory space> [shape: s32[1], index: 0, kind: input, shape index: {}]   ;;  %s918_s1 = inlined_call_operand.vmem [shape: f32[8,16], index: 1, kind: input, shape index: {}]   ;;  %s919_s2 = inlined_call_operand.vmem [shape: f32[16,64], index: 2, kind: input, shape index: {}]   ;;  %s920_s3 = inlined_call_operand.vmem [shape: f32[64,32], index: 3, kind: input, shape index: {}]   ;;  %s921_s4 = inlined_call_operand.vmem [shape: f32[32,32], index: 4, kind: input, shape index: {}]   ;;  %s922_s5 = inlined_call_operand.vmem [shape: f32[16,64], index: 5, kind: input, shape index: {}]   ;;  %s923_s6 = inlined_call_operand.vmem [shape: f32[8,1], index: 6, kind: output, shape index: {}]  }
   0x1   :  { %s739_s22 = smov 0  }
   0x2 LB: > { %s29_s23 = sadd.s32 1, %s692_s0  ;;  %p625_p0 = scmp.ge.s32.totalorder %s696_s22, 1  ;;  %s696_s22 = sphi %s739_s22, %s17_s22   ;;  %s692_s0 = sphi %s737_s0, %s925_s0   ;;  %s688_s21 = sphi %s735_s21, %s924_s21  }
   0x3   : > { %p31_p1 = scmp.ge.s32.totalorder %s29_s23, 3  ;;  %p200_p2 = scmp.lt.s32.totalorder %s696_s22, 4 }
   0x5   : > { %s927_s23 = smov (%p31_p1, %s29_s23), 0  ;;  %p201_p3 = pnand %p625_p0, %p200_p2 }
   0x6   : > { %p627_p4 = scmp.ne.s32.totalorder (!%p201_p3), %s688_s21, 0 }
   0x7   : > { %204 = sbr.rel (%p201_p3) target bundleno = 907 (0x38b), region = 40 }
   0xc   : > { %v758_v0 = vld [vmem:[%s922_s5 + $0x1] sm:$0x1]  ;;  %v763_v1 = vld [vmem:[%s922_s5 + $0x2] sm:$0x1]  ;;  %v768_v2 = vld [vmem:[%s922_s5 + $0x3] sm:$0x1] }
   0xd   : > { %v773_v3 = vld [vmem:[%s922_s5 + $0x4] sm:$0x1]  ;;  %v778_v4 = vld [vmem:[%s922_s5 + $0x5] sm:$0x1]  ;;  %v783_v5 = vld [vmem:[%s922_s5 + $0x6] sm:$0x1] }
   0xe   : > { %v788_v6 = vld [vmem:[%s922_s5 + $0x7] sm:$0x1]  ;;  %v793_v7 = vld [vmem:[%s922_s5 + $0x8] sm:$0x1]  ;;  %vm253_vm0 = vcmask 130048  }
   0xf   : > { %v251_v8 = vld [vmem:[%s919_s2 + $0x8] sm:$0xff]  ;;  %v250_v9 = vld [vmem:[%s919_s2] sm:$0xff] }
  0x10   : > { %271 = vmatpush.msra.mxu0 %v251_v8  ;;  %v249_v10 = vld [vmem:[%s918_s1] sm:$0xff] }
  0x11   : > { %v663_v11 = vld [vmem:[%s922_s5] ss:$0 sm:$0xff] }
  0x12   : > { %272 = vmatpush.msra.mxu0 %v250_v9 }
  0x13   : > { %626 = vmatmul.msk.f32.vlgmr.msra.gmra.mxu0 %vm253_vm0, %v249_v10 }
  0x8f   : > { %281 = sbr.rel (%p627_p4) target bundleno = 167 (0xa7), region = 44 }
  0x90   : > { %v274_v12 = vpop.f32.mrf.mxu0 }
  0x91   : > { %v275_v13 = vadd.f32 %v663_v11, %v274_v12 }
  0x93   : > { %v807_v14 = vmax.f32 %v275_v13, 0.0 }
  0x94   : > { %vm286_vm1 = vcmask 523264   ;;  %v698_v16 = vmov 0.0   ;;  %vm301_vm2 = vcmask 516096  }
  0x95   : > { %v304_v15 = vmul.f32 %v807_v14, %v807_v14  ;;  %287 = vst.msk [vmem:[#allocation2] sm:$0xff] %vm286_vm1, %v698_v16  ;;  %v293_v17 = vsel %vm286_vm1, %v807_v14, 0.0 }
  0x96   : > { %v294_v18 = vrot.slane %v293_v17, 4 }
  0x97   : > { %v305_v19 = vsel %vm286_vm1, %v304_v15, 0.0 }
  0x98   : > { %v306_v20 = vrot.slane %v305_v19, 4  ;;  %v295_v21 = vadd.f32 %v294_v18, %v293_v17 }
  0x9a   : > { %v307_v22 = vadd.f32 %v306_v20, %v305_v19  ;;  %v296_v23 = vrot.slane %v295_v21, 2 }
  0x9c   : > { %v308_v24 = vrot.slane %v307_v22, 2  ;;  %v297_v25 = vadd.f32 %v296_v23, %v295_v21  ;;  %v291_v28 = vld [vmem:[#allocation2] sm:$0x1]  ;;  %v303_v31 = vld [vmem:[#allocation2 + $0x1] sm:$0x1] }
  0x9e   : > { %v309_v26 = vadd.f32 %v308_v24, %v307_v22  ;;  %v298_v27 = vrot.slane %v297_v25, 1 }
  0xa0   : > { %v310_v29 = vrot.slane %v309_v26, 1  ;;  %v299_v30 = vadd.f32 %v298_v27, %v297_v25 }
  0xa2   : > { %v311_v32 = vadd.f32 %v310_v29, %v309_v26  ;;  %v300_v33 = vadd.f32 %v299_v30, %v291_v28 }
  0xa4   : > { %v312_v34 = vadd.f32 %v311_v32, %v303_v31  ;;  %302 = vst.msk [vmem:[#allocation2] sm:$0x1] %vm301_vm2, %v300_v33 }
  0xa6   : > { %313 = vst.msk [vmem:[#allocation2 + $0x1] sm:$0x1] %vm301_vm2, %v312_v34 }
  0xa7 PF: > { %p628_p5 = scmp.ne.s32.totalorder %s688_s21, 1 }
  0xa9   : > { %317 = sbr.rel (%p628_p5) target bundleno = 498 (0x1f2), region = 52 }
  0xae   : > { %v361_v35 = vld [vmem:[%s920_s3 + $0x38] sm:$0xff]  ;;  %v360_v36 = vld [vmem:[%s920_s3 + $0x30] sm:$0xff]  ;;  %v359_v37 = vld [vmem:[%s920_s3 + $0x28] sm:$0xff]  ;;  %vm341_vm6 = vcmask 516096   ;;  %vm363_vm7 = vcmask 523264   ;;  %vm346_vm8 = vcmask 261120  }
  0xaf   : > { %375 = vmatpush.msra.mxu0 %v361_v35  ;;  %v322_v38 = vld [vmem:[#allocation2] sm:$0x1]  ;;  %v324_v40 = vld [vmem:[#allocation2 + $0x1] sm:$0x1]  ;;  %v357_v44 = vld [vmem:[%s920_s3 + $0x18] sm:$0xff]  ;;  %v699_v11 = vmov 0.0  }
  0xb0   : > { %v323_v39 = vmul.f32 0.125, %v322_v38  ;;  %v358_v41 = vld [vmem:[%s920_s3 + $0x20] sm:$0xff]  ;;  %v325_v42 = vmul.f32 0.125, %v324_v40  ;;  %v356_v46 = vld [vmem:[%s920_s3 + $0x10] sm:$0xff]  ;;  %v355_v48 = vld [vmem:[%s920_s3 + $0x8] sm:$0xff]  ;;  %347 = vst.msk [vmem:[#allocation3] sm:$0xff] %vm346_vm8, %v699_v11 }
  0xb1   : > { %376 = vmatpush.msra.mxu0 %v360_v36  ;;  %v354_v50 = vld [vmem:[%s920_s3] sm:$0xff]  ;;  %v391_v51 = vld [vmem:[%s921_s4 + $0x18] sm:$0xff]  ;;  %v390_v10 = vld [vmem:[%s921_s4 + $0x10] sm:$0xff]  ;;  %v362_v12 = vperm.slane %v768_v2, 0  ;;  %v392_v17 = vperm.slane %v773_v3, 0  ;;  %vm430_vm9 = vcmask 253952  }
  0xb2   : > { %v326_v43 = vmul.f32 %v323_v39, %v323_v39  ;;  %409 = vmatpush.msra.mxu1 %v391_v51 }
  0xb3   : > { %377 = vmatpush.msra.mxu0 %v359_v37 }
  0xb4   : > { %v327_v45 = vsub.f32 %v325_v42, %v326_v43  ;;  %410 = vmatpush.msra.mxu1 %v390_v10 }
  0xb5   : > { %378 = vmatpush.msra.mxu0 %v358_v41 }
  0xb6   : > { %v328_v47 = vmax.f32 %v327_v45, 0.0 }
  0xb7   : > { %379 = vmatpush.msra.mxu0 %v357_v44  ;;  %v421_v33 = vld [vmem:[#allocation3] sm:$0x1]  ;;  %v432_v36 = vld [vmem:[#allocation3 + $0x1] sm:$0x1] }
  0xb8   : > { %v329_v49 = vadd.f32 1e-05, %v328_v47 }
  0xb9   : > { %380 = vmatpush.msra.mxu0 %v356_v46 }
  0xba   : > { %666 = vrsqrt.f32 %v329_v49  ;;  %vm336_vm3 = vweird.f32 %v329_v49 }
  0xbb   : > { %381 = vmatpush.msra.mxu0 %v355_v48 }
  0xbd   : > { %382 = vmatpush.msra.mxu0 %v354_v50 }
  0xc0   : > { %v667_v52 = vpop.eup %666 }
  0xc1   : > { %v331_v53 = vmul.f32 %v667_v52, %v329_v49  ;;  %vm337_vm4 = vweird.f32 %v667_v52 }
  0xc2   : > { %vm338_vm5 = vmor %vm336_vm3, %vm337_vm4 }
  0xc3   : > { %v332_v54 = vmul.f32 %v667_v52, %v331_v53 }
  0xc5   : > { %v333_v55 = vmul.f32 0.5, %v332_v54 }
  0xc7   : > { %v334_v56 = vsub.f32 1.5, %v333_v55 }
  0xc9   : > { %v335_v57 = vmul.f32 %v667_v52, %v334_v56 }
  0xcb   : > { %v339_v58 = vsel %vm338_vm5, %v667_v52, %v335_v57 }
  0xcc   : > { %v340_v59 = vmul.f32 %v339_v58, %v758_v0  ;;  %v389_v0 = vld [vmem:[%s921_s4 + $0x8] sm:$0xff] }
  0xcd   : > { %411 = vmatpush.msra.mxu1 %v389_v0 }
  0xce   : > { %342 = vst.msk [vmem:[#allocation2 + $0x2] sm:$0x1] %vm341_vm6, %v340_v59  ;;  %v343_v60 = vmul.f32 %v340_v59, %v323_v39 }
  0xd0   : > { %v344_v61 = vsub.f32 %v763_v1, %v343_v60  ;;  %v388_v1 = vld [vmem:[%s921_s4] sm:$0xff] }
  0xd1   : > { %412 = vmatpush.msra.mxu1 %v388_v1 }
  0xd2   : > { %345 = vst.msk [vmem:[#allocation2 + $0x3] sm:$0x1] %vm341_vm6, %v344_v61 }
  0xd5   : > { %v664_v62 = vld [vmem:[#allocation2 + $0x2] ss:$0 sm:$0xff] }
  0xd6   : > { %v350_v63 = vmul.f32 %v664_v62, %v807_v14 }
  0xd9   : > { %v665_v8 = vld [vmem:[#allocation2 + $0x3] ss:$0 sm:$0xff] }
  0xda   : > { %v353_v9 = vadd.f32 %v665_v8, %v350_v63 }
  0xdc   : > { %629 = vmatmul.msk.f32.vlgmr.msra.gmra.mxu0 %vm363_vm7, %v353_v9 }
 0x159   : > { %v384_v13 = vpop.f32.mrf.mxu0 }
 0x15a   : > { %v385_v15 = vadd.f32 %v384_v13, %v362_v12 }
 0x15c   : > { %v387_v16 = vmax.f32 %v385_v15, 0.0 }
 0x15e   : > { %630 = vmatmul.msk.f32.vlgmr.msra.gmra.mxu1 %vm346_vm8, %v387_v16 }
 0x1db   : > { %v414_v18 = vpop.f32.mrf.mxu1 }
 0x1dc   : > { %v415_v19 = vadd.f32 %v414_v18, %v392_v17 }
 0x1de   : > { %v417_v20 = vmax.f32 %v415_v19, 0.0 }
 0x1e0   : > { %v422_v21 = vsel %vm346_vm8, %v417_v20, 0.0  ;;  %v433_v22 = vmul.f32 %v417_v20, %v417_v20 }
 0x1e1   : > { %v423_v23 = vrot.slane %v422_v21, 4 }
 0x1e2   : > { %v434_v24 = vsel %vm346_vm8, %v433_v22, 0.0 }
 0x1e3   : > { %v424_v25 = vadd.f32 %v423_v23, %v422_v21  ;;  %v435_v26 = vrot.slane %v434_v24, 4 }
 0x1e5   : > { %v425_v27 = vrot.slane %v424_v25, 2  ;;  %v436_v28 = vadd.f32 %v435_v26, %v434_v24 }
 0x1e7   : > { %v426_v29 = vadd.f32 %v425_v27, %v424_v25  ;;  %v437_v30 = vrot.slane %v436_v28, 2 }
 0x1e9   : > { %v427_v31 = vrot.slane %v426_v29, 1  ;;  %v438_v32 = vadd.f32 %v437_v30, %v436_v28 }
 0x1eb   : > { %v428_v34 = vadd.f32 %v427_v31, %v426_v29  ;;  %v439_v35 = vrot.slane %v438_v32, 1 }
 0x1ed   : > { %v429_v37 = vadd.f32 %v428_v34, %v421_v33  ;;  %v440_v38 = vadd.f32 %v439_v35, %v438_v32 }
 0x1ef   : > { %431 = vst.msk [vmem:[#allocation3] sm:$0x1] %vm430_vm9, %v429_v37  ;;  %v441_v39 = vadd.f32 %v440_v38, %v432_v36 }
 0x1f1   : > { %442 = vst.msk [vmem:[#allocation3 + $0x1] sm:$0x1] %vm430_vm9, %v441_v39 }
 0x1f2 PF: > { %p631_p6 = scmp.ne.s32.totalorder %s688_s21, 2 }
 0x1f4   : > { %446 = sbr.rel (%p631_p6) target bundleno = 907 (0x38b), region = 60 }
 0x1f9   : > { %v488_v40 = vld [vmem:[%s920_s3 + $0x38] sm:$0xff]  ;;  %v487_v41 = vld [vmem:[%s920_s3 + $0x30] sm:$0xff]  ;;  %v486_v42 = vld [vmem:[%s920_s3 + $0x28] sm:$0xff]  ;;  %vm490_vm10 = vcmask 523264   ;;  %v489_v0 = vperm.slane %v768_v2, 0  ;;  %vm470_vm14 = vcmask 253952  }
 0x1fa   : > { %502 = vmatpush.msra.mxu0 %v488_v40  ;;  %v485_v43 = vld [vmem:[%s920_s3 + $0x20] sm:$0xff]  ;;  %v518_v45 = vld [vmem:[%s921_s4 + $0x18] sm:$0xff]  ;;  %v483_v47 = vld [vmem:[%s920_s3 + $0x10] sm:$0xff]  ;;  %vm520_vm15 = vcmask 261120   ;;  %v519_v2 = vperm.slane %v773_v3, 0  ;;  %v551_v26 = vperm.slane %v788_v6, 0 }
 0x1fb   : > { %v668_v44 = vld [vmem:[#allocation2 + $0x2] ss:$0 sm:$0xff]  ;;  %536 = vmatpush.msra.mxu1 %v518_v45  ;;  %v484_v46 = vld [vmem:[%s920_s3 + $0x18] sm:$0xff]  ;;  %v669_v49 = vld [vmem:[#allocation2 + $0x3] ss:$0 sm:$0xff]  ;;  %v556_v29 = vperm.slane %v793_v7, 0 }
 0x1fc   : > { %503 = vmatpush.msra.mxu0 %v487_v41  ;;  %v477_v48 = vmul.f32 %v668_v44, %v807_v14  ;;  %v482_v50 = vld [vmem:[%s920_s3 + $0x8] sm:$0xff]  ;;  %v481_v51 = vld [vmem:[%s920_s3] sm:$0xff]  ;;  %v517_v14 = vld [vmem:[%s921_s4 + $0x10] sm:$0xff]  ;;  %vm558_vm0 = vcmask 7168  }
 0x1fd   : > { %537 = vmatpush.msra.mxu1 %v517_v14  ;;  %v516_v53 = vld [vmem:[%s921_s4 + $0x8] sm:$0xff]  ;;  %v515_v54 = vld [vmem:[%s921_s4] sm:$0xff] }
 0x1fe   : > { %504 = vmatpush.msra.mxu0 %v486_v42  ;;  %v480_v52 = vadd.f32 %v669_v49, %v477_v48  ;;  %v451_v55 = vld [vmem:[#allocation3] sm:$0x1]  ;;  %v453_v56 = vld [vmem:[#allocation3 + $0x1] sm:$0x1] }
 0x1ff   : > { %538 = vmatpush.msra.mxu1 %v516_v53  ;;  %v452_v57 = vmul.f32 0.125, %v451_v55  ;;  %v454_v58 = vmul.f32 0.125, %v453_v56 }
 0x200   : > { %505 = vmatpush.msra.mxu0 %v485_v43 }
 0x201   : > { %539 = vmatpush.msra.mxu1 %v515_v54  ;;  %v455_v59 = vmul.f32 %v452_v57, %v452_v57 }
 0x202   : > { %506 = vmatpush.msra.mxu0 %v484_v46 }
 0x203   : > { %v456_v60 = vsub.f32 %v454_v58, %v455_v59 }
 0x204   : > { %507 = vmatpush.msra.mxu0 %v483_v47 }
 0x205   : > { %v457_v61 = vmax.f32 %v456_v60, 0.0 }
 0x206   : > { %508 = vmatpush.msra.mxu0 %v482_v50 }
 0x207   : > { %v458_v62 = vadd.f32 1e-05, %v457_v61 }
 0x208   : > { %509 = vmatpush.msra.mxu0 %v481_v51 }
 0x209   : > { %632 = vmatmul.msk.f32.vlgmr.msra.gmra.mxu0 %vm490_vm10, %v480_v52  ;;  %672 = vrsqrt.f32 %v458_v62  ;;  %vm465_vm11 = vweird.f32 %v458_v62 }
 0x20f   : > { %v673_v63 = vpop.eup %672 }
 0x210   : > { %v460_v8 = vmul.f32 %v673_v63, %v458_v62  ;;  %vm466_vm12 = vweird.f32 %v673_v63 }
 0x211   : > { %vm467_vm13 = vmor %vm465_vm11, %vm466_vm12 }
 0x212   : > { %v461_v9 = vmul.f32 %v673_v63, %v460_v8 }
 0x214   : > { %v462_v10 = vmul.f32 0.5, %v461_v9 }
 0x216   : > { %v463_v1 = vsub.f32 1.5, %v462_v10 }
 0x218   : > { %v464_v11 = vmul.f32 %v673_v63, %v463_v1 }
 0x21a   : > { %v468_v15 = vsel %vm467_vm13, %v673_v63, %v464_v11 }
 0x21b   : > { %v469_v16 = vmul.f32 %v468_v15, %v778_v4 }
 0x21d   : > { %471 = vst.msk [vmem:[#allocation3 + $0x2] sm:$0x1] %vm470_vm14, %v469_v16  ;;  %v472_v18 = vmul.f32 %v469_v16, %v452_v57 }
 0x21f   : > { %v473_v19 = vsub.f32 %v783_v5, %v472_v18 }
 0x221   : > { %474 = vst.msk [vmem:[#allocation3 + $0x3] sm:$0x1] %vm470_vm14, %v473_v19 }
 0x224   : > { %v670_v22 = vld [vmem:[#allocation3 + $0x2] ss:$0 sm:$0xff] }
 0x228   : > { %v671_v24 = vld [vmem:[#allocation3 + $0x3] ss:$0 sm:$0xff] }
 0x286   : > { %v511_v12 = vpop.f32.mrf.mxu0 }
 0x287   : > { %v512_v13 = vadd.f32 %v511_v12, %v489_v0 }
 0x289   : > { %v514_v17 = vmax.f32 %v512_v13, 0.0 }
 0x28b   : > { %633 = vmatmul.msk.f32.vlgmr.msra.gmra.mxu1 %vm520_vm15, %v514_v17 }
 0x308   : > { %v541_v20 = vpop.f32.mrf.mxu1 }
 0x309   : > { %v542_v21 = vadd.f32 %v541_v20, %v519_v2 }
 0x30b   : > { %v544_v23 = vmax.f32 %v542_v21, 0.0 }
 0x30d   : > { %v547_v25 = vmul.f32 %v670_v22, %v544_v23 }
 0x30f   : > { %v550_v27 = vadd.f32 %v671_v24, %v547_v25 }
 0x311   : > { %v552_v4 = vmul.f32 %v551_v26, %v550_v27 }
 0x313   : > { %v553_v28 = vsel %vm520_vm15, %v552_v4, 0.0 }
 0x314   : > { %554 = vadd.xlane.f32.xlu0 %v553_v28 }
 0x387   : > { %v555_v30 = vpop.xlane.xlu0 %554 }
 0x388   : > { %v557_v5 = vadd.f32 %v556_v29, %v555_v30 }
 0x38a   : > { %559 = vst.msk [vmem:[%s923_s6] sm:$0xff] %vm558_vm0, %v557_v5 }
 0x38b PF: > { %s17_s22 = sadd.s32 1, %s696_s22   ;;  %s924_s21 = smov %s692_s0 }
 0x38c   : > { %p14_p7 = scmp.ge.s32.totalorder %s17_s22, 5   ;;  %s925_s0 = smov %s927_s23 }
 0x38e   :  { %16 = sbr.rel (!%p14_p7) target bundleno = 2 (0x2), region = 94 }

</bundles_post_ra>
